<compile_context>
chip_gen: v5e
topology: v5e:2x2
jax: 0.10.0
libtpu: 0.0.40
codegen_flags: <defaults>
</compile_context>

<pallas_src>
import jax
import jax.numpy as jnp
from jax import lax
from jax.experimental import pallas as pl
from jax.experimental.pallas import tpu as pltpu


def _round_up(n, m):
    return ((n + m - 1) // m) * m


def _choose_block_m(B, F_in, *, bytes_per_elem=4, target_tile_bytes=2 << 20):
    """Pick a lane-dense batch tile: ~target_tile_bytes per x tile, >=4 grid
    steps when the batch allows, sized to B to avoid a large padded tail."""
    cap = (target_tile_bytes // (F_in * bytes_per_elem)) // 128 * 128
    cap = max(128, min(cap, 32768))
    n_steps = max(1, -(-B // cap))          # cdiv
    if B >= 4 * 128:
        n_steps = max(n_steps, 4)           # >=2 iters per v7x TensorCore
    block_m = _round_up(-(-B // n_steps), 128)
    return max(128, block_m)


def _vmem_budget(block_m, F_in, h1, h2):
    """Explicit scoped-VMEM budget from actual usage (with 2x headroom)."""
    x_tiles = 2 * block_m * F_in * 4                     # double-buffered input
    out_tiles = 2 * block_m * 4                          # double-buffered output
    inter = (h1 + h2 + 8) * block_m * 4                  # f32 intermediates
    weights = 2 * (h1 * F_in + h2 * h1 + h2 + 64) * 4    # resident weights/bias
    est = x_tiles + out_tiles + inter + weights
    # floor 16 MiB (v5e scoped default is 16 MiB -> be explicit),
    # cap 48 MiB (v7x physical VMEM is only 64 MiB).
    return int(min(max(2 * est, 16 << 20), 48 << 20))


def _make_fnn_kernel(h1, h2, o1, o2, o3):
    """Build the fused-MLP kernel with static layer sizes / bias offsets."""

    def kernel(x_ref, w1_ref, w2_ref, w3_ref, b_ref, o_ref):
        # x_ref : (block_m, F_in) f32   -- natural layout, no wrapper transpose
        # w1_ref: (h1, F_in)      f32   -- resident
        # w2_ref: (h2, h1)        f32   -- resident
        # w3_ref: (h2, 1)         f32   -- final layer done on VPU + reduce
        # b_ref : (P, 1)          f32   -- packed [b1 | b2 | b3], sublane aligned
        x = x_ref[...]
        # NOTE: offsets o1/o2/o3 are sublane-aligned (multiples of 8); h1/h2 not
        # being multiples of 8 only costs a relayout copy, never correctness.
        b1 = b_ref[o1:o1 + h1, :]          # (h1, 1)
        b2 = b_ref[o2:o2 + h2, :]          # (h2, 1)
        b3 = b_ref[o3:o3 + 1, :]           # (1, 1)

        # Layer 1: contract F_in of BOTH operands -> (h1, block_m).
        # Batch rides the lane axis from here on; no explicit transpose needed.
        h = lax.dot_general(
            w1_ref[...], x,
            dimension_numbers=(((1,), (1,)), ((), ())),
            preferred_element_type=jnp.float32,
        ) + b1
        h = jnp.maximum(h, 0.0)

        # Layer 2: (h2, h1) @ (h1, block_m) -> (h2, block_m), ReLU.
        h = jnp.dot(w2_ref[...], h, preferred_element_type=jnp.float32) + b2
        h = jnp.maximum(h, 0.0)

        # Layer 3 (h2 -> 1): VPU multiply + sublane reduce instead of an M=1
        # matmul; result is a lane-dense (1, block_m) slab.
        out = jnp.sum(h * w3_ref[...], axis=0, keepdims=True) + b3

        o_ref[...] = out.astype(o_ref.dtype)

    return kernel


def fnn_forward(x, params, *, block_m=None):
    """x: (B, num_feats) float32. params: dict of w1,b1,w2,b2,w3,b3 (PyTorch layout)."""
    B, F_in = x.shape
    w1, b1 = params["w1"], params["b1"]   # (h1, in), (h1,)
    w2, b2 = params["w2"], params["b2"]   # (h2, h1), (h2,)
    w3, b3 = params["w3"], params["b3"]   # (1, h2), (1,)
    h1, h2 = w1.shape[0], w2.shape[0]

    if block_m is None:
        block_m = _choose_block_m(B, F_in)
    block_m = _round_up(block_m, 128)          # lane-dense tiles / stores
    B_pad = _round_up(B, block_m)
    grid = (B_pad // block_m,)

    # Only the (at most block_m-1 row) tail is padded; no extra pass over x
    # when B is already a multiple of block_m.
    xp = x if B_pad == B else jnp.pad(x, ((0, B_pad - B), (0, 0)))

    w1f = w1.astype(jnp.float32)                               # (h1, F_in)
    w2f = w2.astype(jnp.float32)                               # (h2, h1)
    w3c = w3.reshape(h2, 1).astype(jnp.float32)                # (h2, 1)

    # Pack the three biases into ONE small VMEM array, each at a sublane-aligned
    # offset, instead of three per-step DMA'd (8,128)-padded blocks.
    p1, p2 = _round_up(h1, 8), _round_up(h2, 8)
    P = p1 + p2 + 8
    bias_pack = jnp.zeros((P, 1), jnp.float32)
    bias_pack = bias_pack.at[0:h1, 0].set(b1.astype(jnp.float32))
    bias_pack = bias_pack.at[p1:p1 + h2, 0].set(b2.astype(jnp.float32))
    bias_pack = bias_pack.at[p1 + p2, 0].set(b3.astype(jnp.float32)[0])
    o1, o2, o3 = 0, p1, p1 + p2

    out_t = pl.pallas_call(
        _make_fnn_kernel(h1, h2, o1, o2, o3),
        out_shape=jax.ShapeDtypeStruct((1, B_pad), jnp.float32),
        grid_spec=pltpu.PrefetchScalarGridSpec(
            num_scalar_prefetch=0,
            grid=grid,
            in_specs=[
                pl.BlockSpec((block_m, F_in), lambda i: (i, 0)),   # x batch tile
                pl.BlockSpec((h1, F_in), lambda i: (0, 0)),        # w1 (resident)
                pl.BlockSpec((h2, h1), lambda i: (0, 0)),          # w2 (resident)
                pl.BlockSpec((h2, 1), lambda i: (0, 0)),           # w3 column
                pl.BlockSpec((P, 1), lambda i: (0, 0)),            # packed biases
            ],
            out_specs=pl.BlockSpec((1, block_m), lambda i: (0, i)),
        ),
        compiler_params=pltpu.CompilerParams(
            dimension_semantics=("parallel",),
            vmem_limit_bytes=_vmem_budget(block_m, F_in, h1, h2),
        ),
    )(xp, w1f, w2f, w3c, bias_pack)

    # (1, B_pad) lane-dense slab -> (B, 1) like nn.Linear's output.
    # (Tiny; callers that can consume the slab directly should.)
    return out_t[:, :B].T.astype(x.dtype)


def init_fnn_params(key, num_feats):
    """Deterministic init mirroring nn.Linear default: U(-1/sqrt(fan_in), 1/sqrt(fan_in))."""
    h1 = num_feats // 2
    h2 = h1 // 2
    out = 1
    keys = jax.random.split(key, 6)

    def lin(kw, kb, fan_in, fan_out):
        bound = 1.0 / jnp.sqrt(fan_in)
        w = jax.random.uniform(kw, (fan_out, fan_in), jnp.float32, -bound, bound)
        b = jax.random.uniform(kb, (fan_out,), jnp.float32, -bound, bound)
        return w, b

    w1, b1 = lin(keys[0], keys[1], num_feats, h1)
    w2, b2 = lin(keys[2], keys[3], h1, h2)
    w3, b3 = lin(keys[4], keys[5], h2, out)
    return {"w1": w1, "b1": b1, "w2": w2, "b2": b2, "w3": w3, "b3": b3}


def fnn_ref_f32(x, p):
    """Pure-f32 reference (exact PyTorch semantics)."""
    h = jnp.maximum(x @ p["w1"].T + p["b1"], 0.0)
    h = jnp.maximum(h @ p["w2"].T + p["b2"], 0.0)
    return h @ p["w3"].T + p["b3"]


if __name__ == "__main__":
    key = jax.random.PRNGKey(0)
    kx, kp = jax.random.split(key)

    batch = 512             # -> block_m=128, grid=(4,): >=2 steps per v7x core
    num_feats = 32
    x = jax.random.normal(kx, (batch, num_feats), jnp.float32)
    params = init_fnn_params(kp, num_feats)

    out = fnn_forward(x, params)
    out = jax.block_until_ready(out)
    assert out.shape == (batch, 1), out.shape

    # Kernel is all-f32 now -> tight check vs. the PyTorch-equivalent forward.
    ref = fnn_ref_f32(x, params)
    assert jnp.allclose(out, ref, atol=1e-4, rtol=1e-4), "mismatch vs f32 reference"

    # Also exercise a non-multiple-of-128 batch (padded tail path).
    x2 = jax.random.normal(kx, (300, num_feats), jnp.float32)
    out2 = jax.block_until_ready(fnn_forward(x2, params))
    ref2 = fnn_ref_f32(x2, params)
    assert out2.shape == (300, 1)
    assert jnp.allclose(out2, ref2, atol=1e-4, rtol=1e-4), "mismatch on padded-tail batch"

    print("KERNEL_OK")
</pallas_src>

<mosaic_0001>
module attributes {stable_mosaic.version = 11 : i64} {
  func.func @kernel(%arg0: i32, %arg1: memref<128x32xf32, #tpu.memory_space<vmem>>, %arg2: memref<16x32xf32, #tpu.memory_space<vmem>>, %arg3: memref<8x16xf32, #tpu.memory_space<vmem>>, %arg4: memref<8x1xf32, #tpu.memory_space<vmem>>, %arg5: memref<32x1xf32, #tpu.memory_space<vmem>>, %arg6: memref<1x128xf32, #tpu.memory_space<vmem>>) attributes {dimension_semantics = [#tpu.dimension_semantics<parallel>], iteration_bounds = array<i64: 4>, scalar_prefetch = 0 : i64, scratch_operands = 0 : i64, tpu.core_type = #tpu.core_type<tc>, window_params = [{transform_indices = @transform_0, window_bounds = array<i64: 128, 32>}, {pipeline_mode = #tpu.pipeline_mode<synchronous>, transform_indices = @transform_1, window_bounds = array<i64: 16, 32>}, {pipeline_mode = #tpu.pipeline_mode<synchronous>, transform_indices = @transform_2, window_bounds = array<i64: 8, 16>}, {pipeline_mode = #tpu.pipeline_mode<synchronous>, transform_indices = @transform_3, window_bounds = array<i64: 8, 1>}, {pipeline_mode = #tpu.pipeline_mode<synchronous>, transform_indices = @transform_4, window_bounds = array<i64: 32, 1>}, {transform_indices = @transform_5, window_bounds = array<i64: 1, 128>}]} {
    %c0 = arith.constant 0 : index
    %c0_0 = arith.constant 0 : index
    %0 = vector.load %arg1[%c0, %c0_0] : memref<128x32xf32, #tpu.memory_space<vmem>>, vector<128x32xf32>
    %c0_1 = arith.constant 0 : index
    %c0_2 = arith.constant 0 : index
    %1 = vector.load %arg5[%c0_1, %c0_2] : memref<32x1xf32, #tpu.memory_space<vmem>>, vector<16x1xf32>
    %c16 = arith.constant 16 : index
    %c0_3 = arith.constant 0 : index
    %2 = vector.load %arg5[%c16, %c0_3] : memref<32x1xf32, #tpu.memory_space<vmem>>, vector<8x1xf32>
    %c24 = arith.constant 24 : index
    %c0_4 = arith.constant 0 : index
    %3 = vector.load %arg5[%c24, %c0_4] : memref<32x1xf32, #tpu.memory_space<vmem>>, vector<1x1xf32>
    %c0_5 = arith.constant 0 : index
    %c0_6 = arith.constant 0 : index
    %4 = vector.load %arg2[%c0_5, %c0_6] : memref<16x32xf32, #tpu.memory_space<vmem>>, vector<16x32xf32>
    %cst = arith.constant dense<0.000000e+00> : vector<16x128xf32>
    %5 = tpu.matmul %4, %0, %cst {dimension_numbers = #tpu.dot_dimension_numbers<[1], [1], [0], [0], [0, 0, 1, 0], [], []>} : vector<16x32xf32>, vector<128x32xf32>, vector<16x128xf32> -> vector<16x128xf32>
    %6 = vector.broadcast %1 : vector<16x1xf32> to vector<16x128xf32>
    %7 = arith.addf %5, %6 : vector<16x128xf32>
    %cst_7 = arith.constant 0.000000e+00 : f32
    %8 = vector.broadcast %cst_7 : f32 to vector<16x128xf32>
    %9 = arith.maximumf %7, %8 : vector<16x128xf32>
    %c0_8 = arith.constant 0 : index
    %c0_9 = arith.constant 0 : index
    %10 = vector.load %arg3[%c0_8, %c0_9] : memref<8x16xf32, #tpu.memory_space<vmem>>, vector<8x16xf32>
    %cst_10 = arith.constant dense<0.000000e+00> : vector<8x128xf32>
    %11 = tpu.matmul %10, %9, %cst_10 {dimension_numbers = #tpu.dot_dimension_numbers<[1], [0], [0], [1], [0, 0, 1, 1], [], []>} : vector<8x16xf32>, vector<16x128xf32>, vector<8x128xf32> -> vector<8x128xf32>
    %12 = vector.broadcast %2 : vector<8x1xf32> to vector<8x128xf32>
    %13 = arith.addf %11, %12 : vector<8x128xf32>
    %cst_11 = arith.constant 0.000000e+00 : f32
    %14 = vector.broadcast %cst_11 : f32 to vector<8x128xf32>
    %15 = arith.maximumf %13, %14 : vector<8x128xf32>
    %c0_12 = arith.constant 0 : index
    %c0_13 = arith.constant 0 : index
    %16 = vector.load %arg4[%c0_12, %c0_13] : memref<8x1xf32, #tpu.memory_space<vmem>>, vector<8x1xf32>
    %17 = vector.broadcast %16 : vector<8x1xf32> to vector<8x128xf32>
    %18 = arith.mulf %15, %17 : vector<8x128xf32>
    %cst_14 = arith.constant dense<0.000000e+00> : vector<128xf32>
    %19 = vector.multi_reduction <add>, %18, %cst_14 [0] : vector<8x128xf32> to vector<128xf32>
    %20 = vector.shape_cast %19 : vector<128xf32> to vector<1x128xf32>
    %21 = vector.broadcast %3 : vector<1x1xf32> to vector<1x128xf32>
    %22 = arith.addf %20, %21 : vector<1x128xf32>
    %c0_15 = arith.constant 0 : index
    %c0_16 = arith.constant 0 : index
    %23 = vector.load %arg6[%c0_15, %c0_16] : memref<1x128xf32, #tpu.memory_space<vmem>>, vector<1x128xf32>
    tpu.vector_store %arg6[%c0_15, %c0_16], %22 {strides = array<i32>} : memref<1x128xf32, #tpu.memory_space<vmem>>, vector<1x128xf32>,
    return
  }
  func.func @transform_0(%arg0: i32) -> (i32, i32) {
    %c0_i32 = arith.constant 0 : i32
    %c0_i32_0 = arith.constant 0 : i32
    return %arg0, %c0_i32 : i32, i32
  }
  func.func @transform_1(%arg0: i32) -> (i32, i32) {
    %c0_i32 = arith.constant 0 : i32
    %c0_i32_0 = arith.constant 0 : i32
    %c0_i32_1 = arith.constant 0 : i32
    return %c0_i32, %c0_i32_0 : i32, i32
  }
  func.func @transform_2(%arg0: i32) -> (i32, i32) {
    %c0_i32 = arith.constant 0 : i32
    %c0_i32_0 = arith.constant 0 : i32
    %c0_i32_1 = arith.constant 0 : i32
    return %c0_i32, %c0_i32_0 : i32, i32
  }
  func.func @transform_3(%arg0: i32) -> (i32, i32) {
    %c0_i32 = arith.constant 0 : i32
    %c0_i32_0 = arith.constant 0 : i32
    %c0_i32_1 = arith.constant 0 : i32
    return %c0_i32, %c0_i32_0 : i32, i32
  }
  func.func @transform_4(%arg0: i32) -> (i32, i32) {
    %c0_i32 = arith.constant 0 : i32
    %c0_i32_0 = arith.constant 0 : i32
    %c0_i32_1 = arith.constant 0 : i32
    return %c0_i32, %c0_i32_0 : i32, i32
  }
  func.func @transform_5(%arg0: i32) -> (i32, i32) {
    %c0_i32 = arith.constant 0 : i32
    %c0_i32_0 = arith.constant 0 : i32
    return %c0_i32, %arg0 : i32, i32
  }
}

</mosaic_0001>

<bundles_post_ra>
// kernel: tpu_custom_call.1
= control target key start
LH: loop header
LB: loop body
LE: loop exit
PB: predicated region body
PF: predicated region fallthrough
CT: control target
= control target key end

     0   :  { %10 = vsyncpa [#allocation3], 0  ;;  %s796_s0 = inlined_call_operand.vmem [shape: f32[512,32], index: 0, kind: input, shape index: {}]   ;;  %s797_s1 = inlined_call_operand.vmem [shape: f32[16,32], index: 1, kind: input, shape index: {}]   ;;  %s798_s2 = inlined_call_operand.vmem [shape: f32[8,16], index: 2, kind: input, shape index: {}]   ;;  %s799_s3 = inlined_call_operand.vmem [shape: f32[8,1], index: 3, kind: input, shape index: {}]   ;;  %s800_s4 = inlined_call_operand.vmem [shape: f32[32,1], index: 4, kind: input, shape index: {}]   ;;  %s801_s5 = inlined_call_operand.hbm [shape: f32[1,512], index: 5, kind: output, shape index: {}]  }
   0x1   :  { %12 = vsyncpa [#allocation3 + $0x1], 0  ;;  %s636_s18 = smov 0   ;;  %s638_s19 = smov 0  }
   0x2   :  { %s640_s20 = smov 0   ;;  %s642_s21 = smov 0  }
   0x3 LB: > { %s657_s22 = sadd.s32 4294967295, %s603_s21   ;;  %s455_s23 = sadd.s32 4294967294, %s603_s21   ;;  %s603_s21 = sphi %s642_s21, %s807_s21   ;;  %s599_s20 = sphi %s640_s20, %s806_s20   ;;  %s595_s19 = sphi %s638_s19, %s805_s19   ;;  %s591_s18 = sphi %s636_s18, %s804_s18  }
   0x4   : > { %s661_s24 = sadd.s32 1, %s603_s21   ;;  %s135_s25 = sadd.s32 1, %s599_s20 }
   0x5   : > { %s132_s26 = ssub.s32 %s603_s21, %s661_s24  ;;  %p145_p0 = scmp.ne.s32.totalorder %s599_s20, %s595_s19 }
   0x6   : > { %p133_p1 = scmp.eq.s32.totalorder %s132_s26, 0  ;;  %p146_p2 = scmp.eq.s32.totalorder %s657_s22, 3 }
   0x7   : > { %p151_p3 = scmp.ne.s32.totalorder %s595_s19, %s591_s18  ;;  %p152_p4 = scmp.eq.s32.totalorder %s455_s23, 3 }
   0x8   : > { %s672_s27 = scalar_select %p133_p1, %s599_s20, %s135_s25  }
   0x9   : > { %p674_p5 = por %p146_p2, %p145_p0  ;;  %p678_p6 = por %p152_p4, %p151_p3 }
   0xa   : > { %p458_p7 = scmp.ge.s32.totalorder %s603_s21, 1  ;;  %p191_p8 = scmp.lt.s32.totalorder %s603_s21, 5 }
   0xc   : > { %p192_p9 = pnand %p458_p7, %p191_p8 }
   0xd   : > { %s459_s30 = sshll.u32 (!%p192_p9), %s657_s22, 4  ;;  %s216_s10 = sand.u32 (!%p192_p9), 1, %s595_s19  }
   0xe   : > { %195 = sbr.rel (%p192_p9) target bundleno = 374 (0x176), region = 40  ;;  %p219_p10 = scmp.lt.s32.totalorder (!%p192_p9), %s459_s30, 63 }
   0xf   : > { %s396_s13 = scalar_lea.hbm (!%p192_p9), %s801_s5, %s657_s22  ;;  %s217_s14 = scalar_lea.vmem (!%p192_p9), [#allocation2], %s216_s10 }
  0x10   : > { %s398_s15 = sshll.u32 (!%p192_p9), %s217_s14, 4  ;;  %s400_s16 = sshll.u32 (!%p192_p9), %s396_s13, 4  ;;  %s399_s15 = int_to_ptr.vmem [resolvable:$true] %s398_s15  ;;  %s401_s16 = int_to_ptr.hbm [resolvable:$true] %s400_s16 }
  0x11   : > { %s388_s17 = scalar_lea.sflag (!%p192_p9), [#allocation3], %s216_s10  ;;  %s555_s23 = sshra.s32 (!%p192_p9), %s401_s16, 4  ;;  %s556_s23 = int_to_ptr.hbm [resolvable:$true] %s555_s23 }
  0x12   : > { %s557_s25 = scalar_lea.hbm (!%p192_p9), %s556_s23, 1  ;;  %p562_p0 = scmp.lt.s32.totalorder (!%p192_p9), %s556_s23, %s801_s5 }
  0x13   : > { %s809_s30 = smov (!%p219_p10, %s459_s30), 63  ;;  %vm256_vm0 = vcmask 261120   ;;  %v241_v9 = vld [vmem:[%s800_s4 + $0x8] sm:$0xff]  ;;  %v605_v11 = vmov 0   ;;  %v240_v13 = vld [vmem:[%s800_s4] sm:$0xff]  ;;  %v242_v21 = vld [vmem:[%s800_s4 + $0x10] sm:$0xff]  ;;  %p558_p11 = scmp.ne.s32.totalorder %s556_s23, %s557_s25 }
  0x14   : > { %s460_s6 = sshll.u32 %s809_s30, 3  ;;  %538 = vset.pattern.permute.xlu0 %v605_v11  ;;  %539 = vset.pattern.permute.xlu1 %v605_v11  ;;  %v244_v19 = vld [vmem:[%s797_s1] sm:$0xff]  ;;  %v245_v20 = vld [vmem:[%s797_s1 + $0x8] sm:$0xff]  ;;  %v243_v22 = vld [vmem:[%s800_s4 + $0x18] sm:$0x1]  ;;  %vm342_vm1 = vcmask 130048  }
  0x15   : > { %s688_s9 = scalar_lea.vmem %s796_s0, %s460_s6  ;;  %253 = vperm.xlu0 %538, %v241_v9   ;;  %540 = vset.pattern.permute.xlu2 %v605_v11  ;;  %v367_v23 = vld [vmem:[%s799_s3] sm:$0xff]  ;;  %p559_p12 = pnand %p558_p11, %p674_p5 }
  0x16   : > { %v239_v0 = vld [vmem:[%s688_s9 + $0x78] sm:$0xff]  ;;  %v238_v1 = vld [vmem:[%s688_s9 + $0x70] sm:$0xff]  ;;  %v237_v2 = vld [vmem:[%s688_s9 + $0x68] sm:$0xff]  ;;  %339 = vperm.xlu1 %539, %v242_v21   ;;  %382 = vperm.xlu2 %540, %v243_v22   ;;  %s561_s30 = scalar_lea.hbm %s801_s5, 4 }
  0x17   : > { %461 = vmatpush.xpose.msk.msra.mxu0 %vm256_vm0, %v239_v0  ;;  %482 = vmatpush.xpose.msk.msra.mxu2 %vm256_vm0, %v239_v0  ;;  %v236_v3 = vld [vmem:[%s688_s9 + $0x60] sm:$0xff]  ;;  %v235_v4 = vld [vmem:[%s688_s9 + $0x58] sm:$0xff]  ;;  %v234_v5 = vld [vmem:[%s688_s9 + $0x50] sm:$0xff]  ;;  %p560_p13 = pneg %p559_p12  ;;  %p563_p1 = scmp.lt.s32.totalorder %s561_s30, %s557_s25 }
  0x18   : > { %v233_v6 = vld [vmem:[%s688_s9 + $0x48] sm:$0xff]  ;;  %v232_v7 = vld [vmem:[%s688_s9 + $0x40] sm:$0xff]  ;;  %v231_v8 = vld [vmem:[%s688_s9 + $0x38] sm:$0xff] }
  0x19   : > { %v230_v10 = vld [vmem:[%s688_s9 + $0x30] sm:$0xff]  ;;  %v229_v12 = vld [vmem:[%s688_s9 + $0x28] sm:$0xff]  ;;  %v228_v14 = vld [vmem:[%s688_s9 + $0x20] sm:$0xff]  ;;  %p564_p2 = por %p563_p1, %p562_p0 }
  0x1a   : > { %v227_v15 = vld [vmem:[%s688_s9 + $0x18] sm:$0xff]  ;;  %v226_v16 = vld [vmem:[%s688_s9 + $0x10] sm:$0xff]  ;;  %v225_v17 = vld [vmem:[%s688_s9 + $0x8] sm:$0xff] }
  0x1b   : > { %462 = vmatpush.xpose.msk.msra.mxu0 %vm256_vm0, %v238_v1  ;;  %483 = vmatpush.xpose.msk.msra.mxu2 %vm256_vm0, %v238_v1  ;;  %v224_v18 = vld [vmem:[%s688_s9] sm:$0xff]  ;;  %p565_p3 = pnand %p564_p2, %p560_p13 }
  0x1c   : > { %v336_v32 = vld [vmem:[%s798_s2] sm:$0xff] }
  0x1d   : > { %248 = vperm.xlu0 %538, %v240_v13  }
  0x1e   : > { %370 = vperm.xlu1 %539, %v367_v23  }
  0x1f   : > { %463 = vmatpush.xpose.msk.msra.mxu0 %vm256_vm0, %v237_v2  ;;  %484 = vmatpush.xpose.msk.msra.mxu2 %vm256_vm0, %v237_v2 }
  0x23   : > { %464 = vmatpush.xpose.msk.msra.mxu0 %vm256_vm0, %v236_v3  ;;  %485 = vmatpush.xpose.msk.msra.mxu2 %vm256_vm0, %v236_v3 }
  0x27   : > { %465 = vmatpush.xpose.msk.msra.mxu0 %vm256_vm0, %v235_v4  ;;  %486 = vmatpush.xpose.msk.msra.mxu2 %vm256_vm0, %v235_v4 }
  0x2b   : > { %466 = vmatpush.xpose.msk.msra.mxu0 %vm256_vm0, %v234_v5  ;;  %487 = vmatpush.xpose.msk.msra.mxu2 %vm256_vm0, %v234_v5 }
  0x2f   : > { %467 = vmatpush.xpose.msk.msra.mxu0 %vm256_vm0, %v233_v6  ;;  %488 = vmatpush.xpose.msk.msra.mxu2 %vm256_vm0, %v233_v6 }
  0x33   : > { %468 = vmatpush.xpose.msk.msra.mxu0 %vm256_vm0, %v232_v7  ;;  %489 = vmatpush.xpose.msk.msra.mxu2 %vm256_vm0, %v232_v7 }
  0x37   : > { %469 = vmatpush.xpose.msk.msra.mxu0 %vm256_vm0, %v231_v8  ;;  %490 = vmatpush.xpose.msk.msra.mxu2 %vm256_vm0, %v231_v8 }
  0x3b   : > { %470 = vmatpush.xpose.msk.msra.mxu0 %vm256_vm0, %v230_v10  ;;  %491 = vmatpush.xpose.msk.msra.mxu2 %vm256_vm0, %v230_v10 }
  0x3f   : > { %471 = vmatpush.xpose.msk.msra.mxu0 %vm256_vm0, %v229_v12  ;;  %492 = vmatpush.xpose.msk.msra.mxu2 %vm256_vm0, %v229_v12 }
  0x43   : > { %472 = vmatpush.xpose.msk.msra.mxu0 %vm256_vm0, %v228_v14  ;;  %493 = vmatpush.xpose.msk.msra.mxu2 %vm256_vm0, %v228_v14 }
  0x47   : > { %473 = vmatpush.xpose.msk.msra.mxu0 %vm256_vm0, %v227_v15  ;;  %494 = vmatpush.xpose.msk.msra.mxu2 %vm256_vm0, %v227_v15 }
  0x4b   : > { %474 = vmatpush.xpose.msk.msra.mxu0 %vm256_vm0, %v226_v16  ;;  %495 = vmatpush.xpose.msk.msra.mxu2 %vm256_vm0, %v226_v16 }
  0x4f   : > { %475 = vmatpush.xpose.msk.msra.mxu0 %vm256_vm0, %v225_v17  ;;  %496 = vmatpush.xpose.msk.msra.mxu2 %vm256_vm0, %v225_v17 }
  0x53   : > { %476 = vmatpush.xpose.msk.msra.mxu0 %vm256_vm0, %v224_v18  ;;  %497 = vmatpush.xpose.msk.msra.mxu2 %vm256_vm0, %v224_v18 }
  0x56   : > { %477 = vmatmul.msk.f32.vlgmr.msra.gmra.mxu0 %vm256_vm0, %v244_v19  ;;  %478 = vmatmul.msk.f32.vlgmr.msra.gmra.mxu2 %vm256_vm0, %v245_v20 }
  0x70   : > { %v383_v44 = vpop.permute.xlu2 %382 }
  0x87   : > { %v254_v24 = vpop.permute.xlu0 %253 }
  0x88   : > { %v340_v33 = vpop.permute.xlu1 %339 }
  0x8f   : > { %v249_v25 = vpop.permute.xlu0 %248 }
  0x90   : > { %v371_v37 = vpop.permute.xlu1 %370 }
  0xd3   : > { %v328_v26 = vpop.f32.mrf.mxu0 }
  0xd4   : > { %v329_v28 = vadd.f32 %v328_v26, %v249_v25 }
  0xd6   : > { %v334_v31 = vmax.f32 %v329_v28, 0.0 }
  0xd9   : > { %v331_v27 = vpop.f32.mrf.mxu2 }
  0xda   : > { %v332_v29 = vadd.f32 %v331_v27, %v254_v24 }
  0xdc   : > { %v335_v30 = vmax.f32 %v332_v29, 0.0 }
  0xde   : > { %360 = vmatpush.msra.mxu1 %v335_v30 }
  0xe0   : > { %361 = vmatpush.msra.mxu1 %v334_v31 }
  0xe1   : > { %479 = vmatmul.msk.f32.vlgmr.msra.gmra.mxu1 %vm342_vm1, %v336_v32 }
 0x15e   : > { %v363_v34 = vpop.f32.mrf.mxu1 }
 0x15f   : > { %v364_v35 = vadd.f32 %v363_v34, %v340_v33 }
 0x161   : > { %v366_v36 = vmax.f32 %v364_v35, 0.0 }
 0x163   : > { %v373_v38 = vmul.f32 %v371_v37, %v366_v36 }
 0x165   : > { %v374_v39 = vrot.slane %v373_v38, 4 }
 0x167   : > { %v375_v40 = vadd.f32 %v374_v39, %v373_v38 }
 0x169   : > { %v376_v41 = vrot.slane %v375_v40, 2 }
 0x16b   : > { %v377_v42 = vadd.f32 %v376_v41, %v375_v40 }
 0x16d   : > { %v378_v43 = vrot.slane %v377_v42, 1 }
 0x16f   : > { %v379_v45 = vadd.f32 %v378_v43, %v377_v42 }
 0x171   : > { %v385_v46 = vadd.f32 %v383_v44, %v379_v45 }
 0x173   : > { %386 = vst [vmem:[%s217_s14] sm:$0x1] %v385_v46 }
 0x174   : > { %568 = shalt.err (!%p565_p3)
}
 0x175   : > { %498 = dma.vmem_to_hbm [thread:$0]  (%p674_p5), %s399_s15, 16, %s401_s16, %s388_s17  }
 0x176 PF: > { %p504_p4 = scmp.ge.s32.totalorder %s603_s21, 2  ;;  %s412_s8 = sand.u32 1, %s591_s18  }
 0x177   : > { %s413_s9 = scalar_lea.sflag [#allocation3], %s412_s8 }
 0x178   : > { %p501_p7 = pnand %p504_p4, %p678_p6 }
 0x17a   : > { %p502_p8 = pneg %p501_p7 }
 0x17c   : > { %586 = dma.done.wait (%p502_p8), %s413_s9, 16  }
 0x17d   : > { %588 = vsyncadd (%p502_p8), %s413_s9, 4294967280  ;;  %p15_p9 = scmp.ge.s32.totalorder %s661_s24, 6   ;;  %s804_s18 = smov %s595_s19 }
 0x17e   : > { %s805_s19 = smov %s599_s20  ;;  %s806_s20 = smov %s672_s27 }
 0x17f   : > { %s807_s21 = smov %s661_s24  ;;  %17 = sbr.rel (!%p15_p9) target bundleno = 3 (0x3), region = 75 }
 0x184   :  { %418 = vsyncpa [#allocation3], 1 }
 0x185   :  { %420 = vsyncpa [#allocation3 + $0x1], 1 }

</bundles_post_ra>
